<compile_context>
chip_gen: v6e
topology: v6e:2x2x1
jax: 0.10.0
libtpu: 0.0.40
codegen_flags: <defaults>
</compile_context>

<pallas_src>
import functools

import jax
import jax.numpy as jnp
from jax.experimental import pallas as pl
from jax.experimental.pallas import tpu as pltpu


def _round_up(a: int, b: int) -> int:
    return -(-a // b) * b


@functools.lru_cache(maxsize=1)
def _vmem_budgets():
    """(f32 block byte target, vmem_limit_bytes), sized per TPU generation."""
    try:
        vmem = int(pltpu.get_tpu_info().vmem_capacity_bytes)
    except Exception:
        vmem = 64 * 1024 * 1024                       # conservative (v7x per-TC)
    if vmem < 100 * 1024 * 1024:                      # v7x-class: 64 MiB / TensorCore
        target, limit = 4 * 1024 * 1024, 40 * 1024 * 1024
    else:                                             # v5e / v6e: 128 MiB
        target, limit = 8 * 1024 * 1024, 96 * 1024 * 1024
    return target, min(limit, vmem * 3 // 4)


@functools.lru_cache(maxsize=1)
def _argmax_supported() -> bool:
    """Probe once whether Mosaic lowers a lane-wise argmax; else use the 2-reduce path."""
    def probe(x_ref, o_ref):
        x = x_ref[...]
        pick = jnp.argmax(x, axis=1, keepdims=True).astype(jnp.int32)
        col = jax.lax.broadcasted_iota(jnp.int32, x.shape, 1)
        o_ref[...] = jnp.where(col == pick, x, jnp.float32(0.0))

    try:
        call = pl.pallas_call(
            probe, out_shape=jax.ShapeDtypeStruct((8, 128), jnp.float32))
        jax.jit(call).lower(jax.ShapeDtypeStruct((8, 128), jnp.float32)).compile()
        return True
    except Exception:
        return False


def _kwta_kernel(x_ref, o_ref, *, n_iter, h_valid, complement, use_argmax):
    """One (TB, Hp) tile: knock out n_iter lanes per row, then mask the inputs."""
    tb, hp = x_ref.shape
    knock = jnp.float32(jnp.inf if complement else -jnp.inf)

    def lane():
        # Regenerated on demand: lane iota is a near-free VPU constant, unlike a
        # materialized full-tile i32 array carried across the loop.
        return jax.lax.broadcasted_iota(jnp.int32, (tb, hp), 1)

    work = x_ref[...].astype(jnp.float32)
    if h_valid < hp:
        # Padded lanes must never be picked; the sentinel also marks them "hit",
        # which the final valid-lane mask strips again.
        work = jnp.where(lane() < h_valid, work, knock)

    def knock_one(w):
        col = lane()
        if complement:
            # Pick the minimum, ties toward the HIGHEST index: removing the (H-k)
            # losers this way leaves exactly the torch.topk winner set.
            cur = jnp.min(w, axis=1, keepdims=True)
            pick = jnp.max(jnp.where(w == cur, col, -1), axis=1, keepdims=True)
        elif use_argmax:
            # Single fused XLU pass; first-occurrence tie-break matches torch.topk.
            pick = jnp.argmax(w, axis=1, keepdims=True).astype(jnp.int32)
        else:
            # Robust fallback: row max, then the lowest index attaining it.
            cur = jnp.max(w, axis=1, keepdims=True)
            pick = jnp.min(jnp.where(w == cur, col, hp), axis=1, keepdims=True)
        return jnp.where(col == pick, knock, w)

    if n_iter <= 16:
        for _ in range(n_iter):            # short static trip count: full unroll
            work = knock_one(work)
    else:
        # Single-array carry; unroll=2 gives the scheduler cross-iteration
        # visibility while bounding the live register set.
        work = jax.lax.fori_loop(0, n_iter, lambda _, w: knock_one(w), work,
                                 unroll=2)

    hit = work == knock
    keep = jnp.logical_not(hit) if complement else hit
    if h_valid < hp:
        keep = jnp.logical_and(keep, lane() < h_valid)
    # Re-read x for the epilogue instead of keeping an f32 copy live across the loop.
    o_ref[...] = jnp.where(keep, x_ref[...].astype(jnp.float32),
                           jnp.float32(0.0)).astype(o_ref.dtype)


def sparsify1d_kactive(x, k=1, *, block_b=None, out_dtype=jnp.float32):
    """kWTA forward: keep the top-k entries per row of (batch, features) x."""
    B, H = x.shape
    k = int(k)
    if k <= 0:
        return jnp.zeros((B, H), out_dtype)
    if k >= H:
        # torch.topk errors for k > H; keeping every entry is the natural limit.
        return x.astype(out_dtype)

    # Dense k: knock out the (H - k) losers instead of the k winners.
    complement = (H - k) < k
    n_iter = (H - k) if complement else k
    use_argmax = (not complement) and _argmax_supported()

    # Lane-dense feature dim: pad to a multiple of 128 (unmasked vector stores).
    Hp = max(128, _round_up(H, 128))
    # Sublane multiple for the input dtype's packing (f32:8, bf16:16, int8:32).
    sub = 8 * max(1, 4 // jnp.dtype(x.dtype).itemsize)

    block_target, vmem_limit = _vmem_budgets()
    B_r = _round_up(B, sub)
    if block_b is None:
        tb = max(sub, (block_target // (Hp * 4)) // sub * sub)
    else:
        tb = max(sub, _round_up(int(block_b), sub))
    tb = min(tb, B_r)
    n_tiles = pl.cdiv(B_r, tb)
    if block_b is None:
        if n_tiles == 1 and B_r > sub:
            n_tiles = 2        # give v7x's 2nd TensorCore work / overlap DMA & compute
        tb = _round_up(pl.cdiv(B_r, n_tiles), sub)   # rebalance -> minimal padding
    Bp = tb * pl.cdiv(B_r, tb)

    xp = x
    if Bp != B or Hp != H:
        xp = jnp.pad(x, ((0, Bp - B), (0, Hp - H)))

    kernel = functools.partial(_kwta_kernel, n_iter=n_iter, h_valid=H,
                               complement=complement, use_argmax=use_argmax)
    out = pl.pallas_call(
        kernel,
        out_shape=jax.ShapeDtypeStruct((Bp, Hp), out_dtype),
        grid=(Bp // tb,),
        in_specs=[pl.BlockSpec((tb, Hp), lambda i: (i, 0))],
        out_specs=pl.BlockSpec((tb, Hp), lambda i: (i, 0)),
        compiler_params=pltpu.CompilerParams(
            dimension_semantics=("parallel",),    # shard batch tiles across TCs (v7x)
            vmem_limit_bytes=vmem_limit,
        ),
    )(xp)

    if Bp != B or Hp != H:
        out = out[:B, :H]
    return out


def _reference(x, k):
    # Plain-JAX reference (top_k based).
    k = min(int(k), x.shape[1])
    if k <= 0:
        return jnp.zeros(x.shape, jnp.float32)
    _, idxs = jax.lax.top_k(x, k)
    mask = jax.nn.one_hot(idxs, x.shape[1], dtype=jnp.float32).sum(axis=1)
    return mask * x.astype(jnp.float32)


if __name__ == "__main__":
    key = jax.random.PRNGKey(0)
    k0, k1, k2, k3 = jax.random.split(key, 4)

    # Small demo shape consistent with the module's (batch, features) input.
    batch, hidden, k = 2, 32, 2
    x = jax.random.normal(k0, (batch, hidden), dtype=jnp.float32)
    out = jax.block_until_ready(sparsify1d_kactive(x, k=k))
    assert out.shape == (batch, hidden)
    assert out.dtype == jnp.float32
    assert jnp.allclose(out, _reference(x, k), atol=1e-6), "mismatch (basic)"

    # Multi-tile grid + lane padding.
    x2 = jax.random.normal(k1, (40, 200), dtype=jnp.float32)
    out2 = jax.block_until_ready(sparsify1d_kactive(x2, k=5, block_b=16))
    assert jnp.allclose(out2, _reference(x2, 5), atol=1e-6), "mismatch (tiled)"

    # Dense k -> complement (knock-out-the-losers) path.
    x3 = jax.random.normal(k2, (16, 32), dtype=jnp.float32)
    out3 = jax.block_until_ready(sparsify1d_kactive(x3, k=20))
    assert jnp.allclose(out3, _reference(x3, 20), atol=1e-6), "mismatch (complement)"

    # Large k -> lax.fori_loop(unroll=2) path.
    x4 = jax.random.normal(k3, (8, 256), dtype=jnp.float32)
    out4 = jax.block_until_ready(sparsify1d_kactive(x4, k=24))
    assert jnp.allclose(out4, _reference(x4, 24), atol=1e-6), "mismatch (fori path)"

    print("KERNEL_OK")
</pallas_src>

<mosaic_0001>
module attributes {stable_mosaic.version = 11 : i64} {
  func.func @_kwta_kernel(%arg0: i32, %arg1: memref<8x128xf32, #tpu.memory_space<vmem>>, %arg2: memref<8x128xf32, #tpu.memory_space<vmem>>) attributes {dimension_semantics = [#tpu.dimension_semantics<parallel>], iteration_bounds = array<i64: 1>, scalar_prefetch = 0 : i64, scratch_operands = 0 : i64, tpu.core_type = #tpu.core_type<tc>, window_params = [{transform_indices = @transform_0, window_bounds = array<i64: 8, 128>}, {transform_indices = @transform_1, window_bounds = array<i64: 8, 128>}]} {
    %c0 = arith.constant 0 : index
    %c0_0 = arith.constant 0 : index
    %0 = vector.load %arg1[%c0, %c0_0] : memref<8x128xf32, #tpu.memory_space<vmem>>, vector<8x128xf32>
    %1 = tpu.iota {dimensions = array<i32: 1>} : vector<8x128xi32>
    %c32_i32 = arith.constant 32 : i32
    %2 = vector.broadcast %c32_i32 : i32 to vector<8x128xi32>
    %3 = arith.cmpi slt, %1, %2 : vector<8x128xi32>
    %cst = arith.constant 0xFF800000 : f32
    %4 = vector.broadcast %cst : f32 to vector<8x128xf32>
    %5 = arith.select %3, %0, %4 : vector<8x128xi1>, vector<8x128xf32>
    %6 = tpu.iota {dimensions = array<i32: 1>} : vector<8x128xi32>
    %cst_1 = arith.constant dense<0xFF800000> : vector<8xf32>
    %7 = vector.multi_reduction <maximumf>, %5, %cst_1 [1] : vector<8x128xf32> to vector<8xf32>
    %8 = vector.shape_cast %7 : vector<8xf32> to vector<8x1xf32>
    %9 = vector.broadcast %8 : vector<8x1xf32> to vector<8x128xf32>
    %10 = arith.cmpf oeq, %5, %9 : vector<8x128xf32>
    %c128_i32 = arith.constant 128 : i32
    %11 = vector.broadcast %c128_i32 : i32 to vector<8x128xi32>
    %12 = arith.select %10, %6, %11 : vector<8x128xi1>, vector<8x128xi32>
    %cst_2 = arith.constant dense<2147483647> : vector<8xi32>
    %13 = vector.multi_reduction <minsi>, %12, %cst_2 [1] : vector<8x128xi32> to vector<8xi32>
    %14 = vector.shape_cast %13 : vector<8xi32> to vector<8x1xi32>
    %15 = vector.broadcast %14 : vector<8x1xi32> to vector<8x128xi32>
    %16 = arith.cmpi eq, %6, %15 : vector<8x128xi32>
    %cst_3 = arith.constant 0xFF800000 : f32
    %17 = vector.broadcast %cst_3 : f32 to vector<8x128xf32>
    %18 = arith.select %16, %17, %5 : vector<8x128xi1>, vector<8x128xf32>
    %19 = tpu.iota {dimensions = array<i32: 1>} : vector<8x128xi32>
    %cst_4 = arith.constant dense<0xFF800000> : vector<8xf32>
    %20 = vector.multi_reduction <maximumf>, %18, %cst_4 [1] : vector<8x128xf32> to vector<8xf32>
    %21 = vector.shape_cast %20 : vector<8xf32> to vector<8x1xf32>
    %22 = vector.broadcast %21 : vector<8x1xf32> to vector<8x128xf32>
    %23 = arith.cmpf oeq, %18, %22 : vector<8x128xf32>
    %c128_i32_5 = arith.constant 128 : i32
    %24 = vector.broadcast %c128_i32_5 : i32 to vector<8x128xi32>
    %25 = arith.select %23, %19, %24 : vector<8x128xi1>, vector<8x128xi32>
    %cst_6 = arith.constant dense<2147483647> : vector<8xi32>
    %26 = vector.multi_reduction <minsi>, %25, %cst_6 [1] : vector<8x128xi32> to vector<8xi32>
    %27 = vector.shape_cast %26 : vector<8xi32> to vector<8x1xi32>
    %28 = vector.broadcast %27 : vector<8x1xi32> to vector<8x128xi32>
    %29 = arith.cmpi eq, %19, %28 : vector<8x128xi32>
    %cst_7 = arith.constant 0xFF800000 : f32
    %30 = vector.broadcast %cst_7 : f32 to vector<8x128xf32>
    %31 = arith.select %29, %30, %18 : vector<8x128xi1>, vector<8x128xf32>
    %cst_8 = arith.constant 0xFF800000 : f32
    %32 = vector.broadcast %cst_8 : f32 to vector<8x128xf32>
    %33 = arith.cmpf oeq, %31, %32 : vector<8x128xf32>
    %34 = tpu.iota {dimensions = array<i32: 1>} : vector<8x128xi32>
    %c32_i32_9 = arith.constant 32 : i32
    %35 = vector.broadcast %c32_i32_9 : i32 to vector<8x128xi32>
    %36 = arith.cmpi slt, %34, %35 : vector<8x128xi32>
    %37 = arith.andi %33, %36 : vector<8x128xi1>
    %c0_10 = arith.constant 0 : index
    %c0_11 = arith.constant 0 : index
    %38 = vector.load %arg1[%c0_10, %c0_11] : memref<8x128xf32, #tpu.memory_space<vmem>>, vector<8x128xf32>
    %cst_12 = arith.constant 0.000000e+00 : f32
    %39 = vector.broadcast %cst_12 : f32 to vector<8x128xf32>
    %40 = arith.select %37, %38, %39 : vector<8x128xi1>, vector<8x128xf32>
    %c0_13 = arith.constant 0 : index
    %c0_14 = arith.constant 0 : index
    %41 = vector.load %arg2[%c0_13, %c0_14] : memref<8x128xf32, #tpu.memory_space<vmem>>, vector<8x128xf32>
    tpu.vector_store %arg2[%c0_13, %c0_14], %40 {strides = array<i32>} : memref<8x128xf32, #tpu.memory_space<vmem>>, vector<8x128xf32>,
    return
  }
  func.func @transform_0(%arg0: i32) -> (i32, i32) {
    %c0_i32 = arith.constant 0 : i32
    %c0_i32_0 = arith.constant 0 : i32
    return %arg0, %c0_i32 : i32, i32
  }
  func.func @transform_1(%arg0: i32) -> (i32, i32) {
    %c0_i32 = arith.constant 0 : i32
    %c0_i32_0 = arith.constant 0 : i32
    return %arg0, %c0_i32 : i32, i32
  }
}

</mosaic_0001>

<bundles_post_ra>
// kernel: tpu_custom_call.1
= control target key start
LH: loop header
LB: loop body
LE: loop exit
PB: predicated region body
PF: predicated region fallthrough
CT: control target
= control target key end

     0   :  { %6 = vsyncpa [#allocation3], 0  ;;  %s151_s0 = inlined_call_operand.hbm [shape: f32[8,128], index: 0, kind: input, shape index: {}]   ;;  %s152_s1 = inlined_call_operand.hbm [shape: f32[8,128], index: 1, kind: output, shape index: {}]  }
   0x1   :  { %7 = vsyncpa [#allocation4], 0  ;;  %s131_s6 = smov [#allocation2]  }
   0x2   :  { %s14_s7 = sshll.u32 %s131_s6, 4  ;;  %s15_s7 = int_to_ptr.vmem [resolvable:$true] %s14_s7 }
   0x3   :  { %s95_s8 = scalar_lea.vmem %s15_s7, 128  ;;  %p100_p1 = scmp.lt.s32.totalorder %s15_s7, %s15_s7 }
   0x4   :  { %p96_p0 = scmp.ne.s32.totalorder %s15_s7, %s95_s8  ;;  %p101_p2 = scmp.lt.s32.totalorder %s95_s8, %s95_s8 }
   0x6   :  { %p102_p3 = por %p101_p2, %p100_p1 }
   0x8   :  { %p103_p4 = pnand %p102_p3, %p96_p0 }
   0xa   :  { %106 = shalt.err (!%p103_p4)
}
   0xb   :  { %17 = dma.hbm_to_vmem [thread:$0]  %s151_s0, 128, %s15_s7, [#allocation3]  }
   0xc   :  { %127 = dma.done.wait [#allocation3], 128  }
   0xd   :  { %128 = vsyncadd [#allocation3], 4294967168  ;;  %v22_v0 = vlaneseq  ;;  %v21_v2 = vld [vmem:[#allocation2] sm:$0xff]  ;;  %s132_s0 = smov [#allocation5]  }
   0xe   :  { %s76_s11 = sshll.u32 %s132_s0, 4  ;;  %s77_s11 = int_to_ptr.vmem [resolvable:$true] %s76_s11 }
   0xf   :  { %v23_v1 = vand.u32 127, %v22_v0  ;;  %s107_s12 = scalar_lea.vmem %s77_s11, 128  ;;  %p112_p6 = scmp.lt.s32.totalorder %s77_s11, %s77_s11 }
  0x10   :  { %p108_p5 = scmp.ne.s32.totalorder %s77_s11, %s107_s12  ;;  %p113_p7 = scmp.lt.s32.totalorder %s107_s12, %s107_s12 }
  0x11   :  { %vm24_vm0 = vcmp.lt.s32.totalorder %v23_v1, 32 }
  0x12   :  { %v25_v3 = vsel %vm24_vm0, %v21_v2, -inf  ;;  %p114_p8 = por %p113_p7, %p112_p6 }
  0x13   :  { %26 = vmax.xlane.f32.xlu0 %v25_v3 }
  0x14   :  { %p115_p9 = pnand %p114_p8, %p108_p5 }
  0x9c   :  { %v27_v4 = vpop.xlane.xlu0 %26 }
  0x9d   :  { %vm28_vm1 = vcmp.eq.f32.partialorder %v25_v3, %v27_v4 }
  0x9e   :  { %v29_v5 = vsel %vm28_vm1, %v23_v1, 128 }
  0x9f   :  { %v31_v6 = vshra.s32 %v29_v5, 16  ;;  %v30_v8 = vand.u32 65535, %v29_v5 }
  0xa1   :  { %v33_v7 = vcvt.s32.f32 %v31_v6  ;;  %v32_v10 = vcvt.s32.f32 %v30_v8 }
  0xa3   :  { %34 = vmin.xlane.f32.xlu0 %v33_v7 }
 0x12c   :  { %v35_v9 = vpop.xlane.xlu0 %34 }
 0x12d   :  { %vm36_vm2 = vcmp.eq.f32.partialorder %v33_v7, %v35_v9  ;;  %v41_v12 = vcvt.f32.s32 %v35_v9 }
 0x12e   :  { %v37_v11 = vsel %vm36_vm2, %v32_v10, inf }
 0x12f   :  { %38 = vmin.xlane.f32.xlu1 %v37_v11  ;;  %v42_v14 = vshll.u32 %v41_v12, 16 }
 0x1b8   :  { %v39_v13 = vpop.xlane.xlu1 %38 }
 0x1b9   :  { %v40_v15 = vcvt.f32.s32 %v39_v13 }
 0x1bb   :  { %v43_v16 = vadd.s32 %v42_v14, %v40_v15 }
 0x1bd   :  { %vm44_vm3 = vcmp.eq.s32.totalorder %v23_v1, %v43_v16 }
 0x1be   :  { %v45_v17 = vsel %vm44_vm3, -inf, %v25_v3 }
 0x1bf   :  { %46 = vmax.xlane.f32.xlu1 %v45_v17 }
 0x248   :  { %v47_v18 = vpop.xlane.xlu1 %46 }
 0x249   :  { %vm48_vm4 = vcmp.eq.f32.partialorder %v45_v17, %v47_v18 }
 0x24a   :  { %v49_v19 = vsel %vm48_vm4, %v23_v1, 128 }
 0x24b   :  { %v51_v20 = vshra.s32 %v49_v19, 16  ;;  %v50_v22 = vand.u32 65535, %v49_v19 }
 0x24d   :  { %v53_v21 = vcvt.s32.f32 %v51_v20  ;;  %v52_v24 = vcvt.s32.f32 %v50_v22 }
 0x24f   :  { %54 = vmin.xlane.f32.xlu0 %v53_v21 }
 0x2d8   :  { %v55_v23 = vpop.xlane.xlu0 %54 }
 0x2d9   :  { %vm56_vm5 = vcmp.eq.f32.partialorder %v53_v21, %v55_v23  ;;  %v61_v26 = vcvt.f32.s32 %v55_v23 }
 0x2da   :  { %v57_v25 = vsel %vm56_vm5, %v52_v24, inf }
 0x2db   :  { %58 = vmin.xlane.f32.xlu1 %v57_v25  ;;  %v62_v28 = vshll.u32 %v61_v26, 16 }
 0x364   :  { %v59_v27 = vpop.xlane.xlu1 %58 }
 0x365   :  { %v60_v29 = vcvt.f32.s32 %v59_v27 }
 0x367   :  { %v63_v30 = vadd.s32 %v62_v28, %v60_v29 }
 0x369   :  { %vm64_vm6 = vcmp.eq.s32.totalorder %v23_v1, %v63_v30 }
 0x36a   :  { %v65_v31 = vsel %vm64_vm6, -inf, %v45_v17 }
 0x36b   :  { %vm66_vm7 = vcmp.eq.f32.partialorder %v65_v31, -inf }
 0x36c   :  { %vm67_vm8 = vmand %vm66_vm7, %vm24_vm0 }
 0x36d   :  { %v68_v32 = vsel %vm67_vm8, %v21_v2, 0.0 }
 0x36e   :  { %69 = vst [vmem:[#allocation5] sm:$0xff] %v68_v32 }
 0x36f   :  { %118 = shalt.err (!%p115_p9)
}
 0x370   :  { %79 = dma.vmem_to_hbm [thread:$0]  %s77_s11, 128, %s152_s1, [#allocation4]  }
 0x371   :  { %129 = dma.done.wait [#allocation4], 128  }
 0x372   :  { %130 = vsyncadd [#allocation4], 4294967168 }
 0x373   :  { %83 = vsyncpa [#allocation3], 1 }
 0x374   :  { %84 = vsyncpa [#allocation4], 1 }

</bundles_post_ra>
